<compile_context>
chip_gen: v7x
topology: tpu7x:2x2x1
jax: 0.10.0
libtpu: 0.0.40
codegen_flags: <defaults>
</compile_context>

<pallas_src>
import functools

import jax
import jax.numpy as jnp
from jax.experimental import pallas as pl
from jax.experimental.pallas import tpu as pltpu


def _round_up(x, m):
    return ((x + m - 1) // m) * m


def _pick_row_tile(n_rows, row_bytes, row_quantum, *, target_bytes=2 << 20,
                   max_rows=1 << 15):
    """Row tile: multiple of row_quantum, ~target_bytes per block, <= padded size."""
    t = max(row_quantum, min(max_rows, target_bytes // max(row_bytes, 1)))
    t = max(row_quantum, (t // row_quantum) * row_quantum)
    t = min(t, _round_up(n_rows, row_quantum))
    return int(t)


# --------- pass 1: per-metapath sum over nodes of tanh(z @ W1 + b1) ----------
def _hsum_kernel(z_ref, w1bd_ref, b1t_ref, acc_ref, *, tn, n_valid, mask_pad):
    # z_ref: (tn, M*D); w1bd_ref: (M*D, M*H) block-diagonal; b1t_ref: (1, M*H)
    # acc_ref: (8, M*H) lane-dense resident partial-sum accumulator.
    c = pl.program_id(0)          # core-parallel axis
    i = pl.program_id(1)          # node-tile reduction axis

    @pl.when(i == 0)
    def _():
        acc_ref[...] = jnp.zeros_like(acc_ref)

    h = jnp.tanh(
        jnp.dot(z_ref[...], w1bd_ref[...], preferred_element_type=jnp.float32)
        + b1t_ref[...]
    )                                                   # (tn, M*H)

    if mask_pad:
        # exact masking of zero-padded rows (they'd contribute tanh(b1) otherwise)
        row0 = (c * pl.num_programs(1) + i) * tn
        rid = row0 + jax.lax.broadcasted_iota(jnp.int32, h.shape, 0)
        h = jnp.where(rid < n_valid, h, 0.0)

    mh = h.shape[1]
    # fold sublane groups together: (tn, MH) -> (tn//8, 8, MH) -> sum over axis 0
    # (layout-preserving split of the sublane axis; pure VPU vreg adds, no XLU)
    acc_ref[...] += jnp.sum(h.reshape(tn // 8, 8, mh), axis=0)


# --------- pass 2: out[n] = sum_m beta[m] * z[n, m, :] -----------------------
def _weighted_sum_kernel(beta_ref, z_ref, o_ref, *, M, D, k_grp):
    # beta_ref: SMEM (M,) f32 scalars; z_ref: (tg, k*M*D); o_ref: (tg, k*D)
    zblk = z_ref[...]
    betas = [beta_ref[m] for m in range(M)]
    for j in range(k_grp):
        base = j * M * D
        acc = zblk[:, base:base + D] * betas[0]
        for m in range(1, M):
            acc = acc + zblk[:, base + m * D:base + (m + 1) * D] * betas[m]
        o_ref[:, j * D:(j + 1) * D] = acc


def semantic_attention(z, w1, b1, w2, *, row_tile=None,
                       vmem_limit_bytes=32 * 1024 * 1024):
    """HAN semantic attention. z: (N, M, D) f32 -> (N, D) f32."""
    N, M, D = z.shape
    H = w1.shape[1]
    MD = M * D
    MH = M * H

    # lane-grouping factor so pass-2 output blocks are >= 128 lanes wide
    if D < 128 and 128 % D == 0:
        k_grp = 128 // D
    else:
        k_grp = 1
    rq = 8 * k_grp

    z2 = z.reshape(N, MD).astype(jnp.float32)           # lane-dense view (free)
    row_bytes = MD * 4

    if row_tile is None:
        tn = _pick_row_tile(N, row_bytes, rq)
    else:
        tn = max(rq, (min(int(row_tile), _round_up(N, rq)) // rq) * rq)

    tiles0 = pl.cdiv(N, tn)
    nc = 2 if tiles0 >= 2 else 1        # parallel pass-1 split (both TCs on v7x)
    n_pad = _round_up(N, nc * tn)
    if n_pad != N:
        z2 = jnp.pad(z2, ((0, n_pad - N), (0, 0)))
    per_core = n_pad // (nc * tn)
    mask_pad = (n_pad != N)

    # block-diagonal W1: one 128+-wide MXU matmul per tile instead of M slivers
    # (use while M*D stays modest, <= ~512 lanes; true for HAN-sized problems)
    w1_bd = jnp.kron(jnp.eye(M, dtype=jnp.float32), w1.astype(jnp.float32))  # (MD, MH)
    b1_t = jnp.tile(b1.astype(jnp.float32), M).reshape(1, MH)

    # ---- pass 1: lane-dense (nc, 8, M*H) partial sums of tanh(z @ W1 + b1) ----
    hsum_parts = pl.pallas_call(
        functools.partial(_hsum_kernel, tn=tn, n_valid=N, mask_pad=mask_pad),
        out_shape=jax.ShapeDtypeStruct((nc, 8, MH), jnp.float32),
        grid_spec=pltpu.PrefetchScalarGridSpec(
            num_scalar_prefetch=0,
            grid=(nc, per_core),
            in_specs=[
                pl.BlockSpec((tn, MD), lambda c, i: (c * per_core + i, 0)),
                pl.BlockSpec((MD, MH), lambda c, i: (0, 0)),
                pl.BlockSpec((1, MH), lambda c, i: (0, 0)),
            ],
            out_specs=pl.BlockSpec((None, 8, MH), lambda c, i: (c, 0, 0)),
        ),
        compiler_params=pltpu.CompilerParams(
            dimension_semantics=("parallel", "arbitrary"),
            vmem_limit_bytes=vmem_limit_bytes,
        ),
    )(z2, w1_bd, b1_t)

    hsum = hsum_parts.sum(axis=(0, 1)).reshape(M, H)      # (M, H)

    # tiny (M,H) @ (H,1), mean over N, softmax over M -> plain JAX (no MXU sliver)
    w_mean = (hsum / float(N)) @ w2.astype(jnp.float32)   # (M, 1)
    beta = jax.nn.softmax(w_mean[:, 0], axis=0)           # (M,) scalars -> SMEM

    # ---- pass 2: weighted sum over metapaths, lane-dense grouped output ----
    z2g = z2.reshape(n_pad // k_grp, k_grp * MD)          # free HBM reshape
    tg = tn // k_grp
    grid_n = n_pad // tn

    out_g = pl.pallas_call(
        functools.partial(_weighted_sum_kernel, M=M, D=D, k_grp=k_grp),
        out_shape=jax.ShapeDtypeStruct((n_pad // k_grp, k_grp * D), jnp.float32),
        grid_spec=pltpu.PrefetchScalarGridSpec(
            num_scalar_prefetch=0,
            grid=(grid_n,),
            in_specs=[
                pl.BlockSpec(memory_space=pltpu.MemorySpace.SMEM),   # beta scalars
                pl.BlockSpec((tg, k_grp * MD), lambda i: (i, 0)),
            ],
            out_specs=pl.BlockSpec((tg, k_grp * D), lambda i: (i, 0)),
        ),
        compiler_params=pltpu.CompilerParams(
            dimension_semantics=("parallel",),
            vmem_limit_bytes=vmem_limit_bytes,
        ),
    )(beta, z2g)

    return out_g.reshape(n_pad, D)[:N]


def _reference(z, w1, b1, w2):
    w = jnp.tanh(z @ w1 + b1[None, None, :]) @ w2        # (N, M, 1)
    w = w.mean(axis=0)                                   # (M, 1)
    beta = jax.nn.softmax(w, axis=0)                     # (M, 1)
    return (beta[None, :, :] * z).sum(axis=1)            # (N, D)


if __name__ == "__main__":
    # TODO(synk): the GATConv metapath encoders + dgl.metapath_reachable_graph in
    # HANLayer are sparse graph message-passing ops; only the SemanticAttention
    # core (fusion over the stacked per-metapath embeddings) is implemented here.
    key = jax.random.PRNGKey(0)
    kz, kw1, kb1, kw2, kz2, kz3, kw3, kb3, kv3 = jax.random.split(key, 9)

    # small shapes: N nodes, M metapaths, D = out_size*num_heads, H = hidden_size
    N, M, D, H = 16, 4, 32, 32
    z = jax.random.normal(kz, (N, M, D), dtype=jnp.float32)
    w1 = jax.random.normal(kw1, (D, H), dtype=jnp.float32) * (1.0 / jnp.sqrt(D))
    b1 = jax.random.normal(kb1, (H,), dtype=jnp.float32) * 0.1
    w2 = jax.random.normal(kw2, (H, 1), dtype=jnp.float32) * (1.0 / jnp.sqrt(H))

    out = jax.block_until_ready(semantic_attention(z, w1, b1, w2))
    ref = _reference(z, w1, b1, w2)
    assert out.shape == (N, D)
    assert jnp.allclose(out, ref, atol=1e-5, rtol=1e-5), "mismatch vs reference (small)"

    # second check: non-tile-multiple N exercises padding + in-kernel masking,
    # the 2-way parallel pass-1 grid, the multi-step accumulation, and the
    # grouped lane-dense pass-2 output (k_grp = 4 for D = 32).
    N2 = 1000
    z_big = jax.random.normal(kz2, (N2, M, D), dtype=jnp.float32)
    out_big = jax.block_until_ready(
        semantic_attention(z_big, w1, b1, w2, row_tile=128))
    ref_big = _reference(z_big, w1, b1, w2)
    assert out_big.shape == (N2, D)
    assert jnp.allclose(out_big, ref_big, atol=1e-4, rtol=1e-4), "mismatch vs reference (big)"

    # third check: D = 128 exercises the ungrouped (k_grp = 1) pass-2 path.
    N3, M3, D3, H3 = 40, 3, 128, 16
    z3 = jax.random.normal(kz3, (N3, M3, D3), dtype=jnp.float32)
    w13 = jax.random.normal(kw3, (D3, H3), dtype=jnp.float32) * (1.0 / jnp.sqrt(D3))
    b13 = jax.random.normal(kb3, (H3,), dtype=jnp.float32) * 0.1
    w23 = jax.random.normal(kv3, (H3, 1), dtype=jnp.float32) * (1.0 / jnp.sqrt(H3))
    out3 = jax.block_until_ready(
        semantic_attention(z3, w13, b13, w23, row_tile=16))
    ref3 = _reference(z3, w13, b13, w23)
    assert out3.shape == (N3, D3)
    assert jnp.allclose(out3, ref3, atol=1e-4, rtol=1e-4), "mismatch vs reference (D=128)"

    print("KERNEL_OK")
</pallas_src>

<mosaic_0001>
module attributes {stable_mosaic.version = 11 : i64} {
  func.func @_hsum_kernel(%arg0: i32, %arg1: i32, %arg2: memref<32x128xf32, #tpu.memory_space<vmem>>, %arg3: memref<128x128xf32, #tpu.memory_space<vmem>>, %arg4: memref<1x128xf32, #tpu.memory_space<vmem>>, %arg5: memref<1x8x128xf32, #tpu.memory_space<vmem>>) attributes {dimension_semantics = [#tpu.dimension_semantics<parallel>, #tpu.dimension_semantics<arbitrary>], iteration_bounds = array<i64: 1, 1>, scalar_prefetch = 0 : i64, scratch_operands = 0 : i64, tpu.core_type = #tpu.core_type<tc>, window_params = [{transform_indices = @transform_0, window_bounds = array<i64: 32, 128>}, {pipeline_mode = #tpu.pipeline_mode<synchronous>, transform_indices = @transform_1, window_bounds = array<i64: 128, 128>}, {pipeline_mode = #tpu.pipeline_mode<synchronous>, transform_indices = @transform_2, window_bounds = array<i64: 1, 128>}, {transform_indices = @transform_3, window_bounds = array<i64: 1, 8, 128>}]} {
    %c0_i32 = arith.constant 0 : i32
    %0 = arith.cmpi eq, %arg1, %c0_i32 : i32
    %1 = arith.extui %0 : i1 to i32
    %c0_i32_0 = arith.constant 0 : i32
    %2 = arith.cmpi ne, %1, %c0_i32_0 : i32
    scf.if %2 {
      %cst_14 = arith.constant 0.000000e+00 : f32
      %28 = vector.broadcast %cst_14 : f32 to vector<8x128xf32>
      %c0_15 = arith.constant 0 : index
      %c0_16 = arith.constant 0 : index
      %c0_17 = arith.constant 0 : index
      %29 = vector.load %arg5[%c0_15, %c0_16, %c0_17] : memref<1x8x128xf32, #tpu.memory_space<vmem>>, vector<1x8x128xf32>
      %30 = vector.shape_cast %29 : vector<1x8x128xf32> to vector<8x128xf32>
      %31 = vector.shape_cast %28 : vector<8x128xf32> to vector<1x8x128xf32>
      tpu.vector_store %arg5[%c0_15, %c0_16, %c0_17], %31 {strides = array<i32>} : memref<1x8x128xf32, #tpu.memory_space<vmem>>, vector<1x8x128xf32>,
    } else {
    }
    %c0 = arith.constant 0 : index
    %c0_1 = arith.constant 0 : index
    %3 = vector.load %arg2[%c0, %c0_1] : memref<32x128xf32, #tpu.memory_space<vmem>>, vector<32x128xf32>
    %c0_2 = arith.constant 0 : index
    %c0_3 = arith.constant 0 : index
    %4 = vector.load %arg3[%c0_2, %c0_3] : memref<128x128xf32, #tpu.memory_space<vmem>>, vector<128x128xf32>
    %cst = arith.constant dense<0.000000e+00> : vector<32x128xf32>
    %5 = tpu.matmul %3, %4, %cst {dimension_numbers = #tpu.dot_dimension_numbers<[1], [0], [0], [1], [0, 0, 1, 1], [], []>} : vector<32x128xf32>, vector<128x128xf32>, vector<32x128xf32> -> vector<32x128xf32>
    %c0_4 = arith.constant 0 : index
    %c0_5 = arith.constant 0 : index
    %6 = vector.load %arg4[%c0_4, %c0_5] : memref<1x128xf32, #tpu.memory_space<vmem>>, vector<1x128xf32>
    %7 = vector.broadcast %6 : vector<1x128xf32> to vector<32x128xf32>
    %8 = arith.addf %5, %7 : vector<32x128xf32>
    %9 = math.tanh %8 : vector<32x128xf32>
    %c1_i32 = arith.constant 1 : i32
    %10 = arith.muli %arg0, %c1_i32 : i32
    %11 = arith.addi %10, %arg1 : i32
    %c32_i32 = arith.constant 32 : i32
    %12 = arith.muli %11, %c32_i32 : i32
    %13 = tpu.iota {dimensions = array<i32: 0>} : vector<32x128xi32>
    %14 = vector.broadcast %12 : i32 to vector<32x128xi32>
    %15 = arith.addi %14, %13 : vector<32x128xi32>
    %c16_i32 = arith.constant 16 : i32
    %16 = vector.broadcast %c16_i32 : i32 to vector<32x128xi32>
    %17 = arith.cmpi slt, %15, %16 : vector<32x128xi32>
    %cst_6 = arith.constant 0.000000e+00 : f32
    %18 = vector.broadcast %cst_6 : f32 to vector<32x128xf32>
    %19 = arith.select %17, %9, %18 : vector<32x128xi1>, vector<32x128xf32>
    %c0_7 = arith.constant 0 : index
    %c0_8 = arith.constant 0 : index
    %c0_9 = arith.constant 0 : index
    %20 = vector.load %arg5[%c0_7, %c0_8, %c0_9] : memref<1x8x128xf32, #tpu.memory_space<vmem>>, vector<1x8x128xf32>
    %21 = vector.shape_cast %20 : vector<1x8x128xf32> to vector<8x128xf32>
    %22 = vector.shape_cast %19 : vector<32x128xf32> to vector<4x8x128xf32>
    %cst_10 = arith.constant dense<0.000000e+00> : vector<8x128xf32>
    %23 = vector.multi_reduction <add>, %22, %cst_10 [0] : vector<4x8x128xf32> to vector<8x128xf32>
    %24 = arith.addf %21, %23 : vector<8x128xf32>
    %c0_11 = arith.constant 0 : index
    %c0_12 = arith.constant 0 : index
    %c0_13 = arith.constant 0 : index
    %25 = vector.load %arg5[%c0_11, %c0_12, %c0_13] : memref<1x8x128xf32, #tpu.memory_space<vmem>>, vector<1x8x128xf32>
    %26 = vector.shape_cast %25 : vector<1x8x128xf32> to vector<8x128xf32>
    %27 = vector.shape_cast %24 : vector<8x128xf32> to vector<1x8x128xf32>
    tpu.vector_store %arg5[%c0_11, %c0_12, %c0_13], %27 {strides = array<i32>} : memref<1x8x128xf32, #tpu.memory_space<vmem>>, vector<1x8x128xf32>,
    return
  }
  func.func @transform_0(%arg0: i32, %arg1: i32) -> (i32, i32) {
    %c1_i32 = arith.constant 1 : i32
    %0 = arith.muli %arg0, %c1_i32 : i32
    %1 = arith.addi %0, %arg1 : i32
    %c0_i32 = arith.constant 0 : i32
    %c0_i32_0 = arith.constant 0 : i32
    return %1, %c0_i32 : i32, i32
  }
  func.func @transform_1(%arg0: i32, %arg1: i32) -> (i32, i32) {
    %c0_i32 = arith.constant 0 : i32
    %c0_i32_0 = arith.constant 0 : i32
    %c0_i32_1 = arith.constant 0 : i32
    return %c0_i32, %c0_i32_0 : i32, i32
  }
  func.func @transform_2(%arg0: i32, %arg1: i32) -> (i32, i32) {
    %c0_i32 = arith.constant 0 : i32
    %c0_i32_0 = arith.constant 0 : i32
    %c0_i32_1 = arith.constant 0 : i32
    return %c0_i32, %c0_i32_0 : i32, i32
  }
  func.func @transform_3(%arg0: i32, %arg1: i32) -> (i32, i32, i32) {
    %c0_i32 = arith.constant 0 : i32
    %c0_i32_0 = arith.constant 0 : i32
    %c0_i32_1 = arith.constant 0 : i32
    return %arg0, %c0_i32, %c0_i32_0 : i32, i32, i32
  }
}

</mosaic_0001>

<bundles_post_ra>
// kernel: tpu_custom_call.1
= control target key start
LH: loop header
LB: loop body
LE: loop exit
PB: predicated region body
PF: predicated region fallthrough
CT: control target
= control target key end

     0   :  { %8 = vsyncpa [#allocation3], 0  ;;  %s465_s0 = inlined_call_operand.hbm [shape: f32[32,128], index: 0, kind: input, shape index: {}]   ;;  %s466_s1 = inlined_call_operand.hbm [shape: f32[128,128], index: 1, kind: input, shape index: {}]   ;;  %s467_s2 = inlined_call_operand.vmem [shape: f32[1,128], index: 2, kind: input, shape index: {}]   ;;  %s468_s3 = inlined_call_operand.hbm [shape: f32[1,8,128], index: 3, kind: output, shape index: {}]  }
   0x1   :  { %9 = vsyncpa [#allocation6], 0 }
   0x2   :  { %10 = vsyncpa [#allocation4], 0  ;;  %s401_s12 = smov [#allocation2]   ;;  %s329_s16 = scalar_lea.hbm %s465_s0, 512 }
   0x3   :  { %s20_s13 = sshll.u32 %s401_s12, 4  ;;  %p330_p0 = scmp.ne.s32.totalorder %s465_s0, %s329_s16  ;;  %s21_s13 = int_to_ptr.vmem [resolvable:$true] %s20_s13 }
   0x4   :  { %p333_p1 = scmp.lt.u32.totalorder %s329_s16, %s465_s0 }
   0x6   :  { %p335_p2 = pnand %p333_p1, %p330_p0 }
   0x8   :  { %338 = shalt.err (!%p335_p2)
}
   0x9   :  { %s339_s21 = scalar_lea.vmem %s21_s13, 512  ;;  %p344_p4 = scmp.lt.s32.totalorder %s21_s13, %s21_s13 }
   0xa   :  { %p340_p3 = scmp.ne.s32.totalorder %s21_s13, %s339_s21  ;;  %p345_p5 = scmp.lt.s32.totalorder %s339_s21, %s339_s21 }
   0xc   :  { %p346_p6 = por %p345_p5, %p344_p4 }
   0xe   :  { %p347_p7 = pnand %p346_p6, %p340_p3 }
  0x10   :  { %350 = shalt.err (!%p347_p7)
}
  0x11   :  { %s402_s22 = smov 128   ;;  %s403_s23 = smov 8  }
  0x12   :  { %26 = dma.hbm_to_vmem [thread:$0]  %s465_s0, 512, %s21_s13, [#allocation3], %s402_s22, %s402_s22, %s403_s23  }
  0x13   :  { %s404_s26 = smov [#allocation5]   ;;  %s351_s30 = scalar_lea.hbm %s466_s1, 2048 }
  0x14   :  { %s32_s27 = sshll.u32 %s404_s26, 4  ;;  %p352_p8 = scmp.ne.s32.totalorder %s466_s1, %s351_s30  ;;  %s33_s27 = int_to_ptr.vmem [resolvable:$true] %s32_s27 }
  0x15   :  { %p355_p9 = scmp.lt.u32.totalorder %s351_s30, %s466_s1 }
  0x17   :  { %p357_p10 = pnand %p355_p9, %p352_p8 }
  0x19   :  { %360 = shalt.err (!%p357_p10)
}
  0x1a   :  { %s361_s8 = scalar_lea.vmem %s33_s27, 2048  ;;  %p366_p12 = scmp.lt.s32.totalorder %s33_s27, %s33_s27 }
  0x1b   :  { %p362_p11 = scmp.ne.s32.totalorder %s33_s27, %s361_s8  ;;  %p367_p13 = scmp.lt.s32.totalorder %s361_s8, %s361_s8 }
  0x1d   :  { %p368_p0 = por %p367_p13, %p366_p12 }
  0x1f   :  { %p369_p1 = pnand %p368_p0, %p362_p11 }
  0x21   :  { %372 = shalt.err (!%p369_p1)
}
  0x22   :  { %38 = dma.hbm_to_vmem [thread:$0]  %s466_s1, 2048, %s33_s27, [#allocation6], %s402_s22, %s402_s22, %s403_s23  }
  0x23   :  { %395 = dma.done.wait [#allocation3], 512  }
  0x24   :  { %396 = vsyncadd [#allocation3], 4294966784 }
  0x25   :  { %397 = dma.done.wait [#allocation6], 2048  }
  0x26   :  { %398 = vsyncadd [#allocation6], 4294965248  ;;  %v58_v0 = vld [vmem:[#allocation5] sm:$0xff]  ;;  %v59_v1 = vld [vmem:[#allocation5 + $0x8] sm:$0xff]  ;;  %s405_s11 = smov [#allocation7]  }
  0x27   :  { %v60_v2 = vld [vmem:[#allocation5 + $0x10] sm:$0xff]  ;;  %v271_v3 = vpack.c.bf16 %v59_v1, %v58_v0  ;;  %v61_v4 = vld [vmem:[#allocation5 + $0x18] sm:$0xff]  ;;  %v62_v6 = vld [vmem:[#allocation5 + $0x20] sm:$0xff]  ;;  %s202_s12 = sshll.u32 %s405_s11, 4  ;;  %s203_s12 = int_to_ptr.vmem [resolvable:$true] %s202_s12 }
  0x28   :  { %v275_v5 = vpack.c.bf16 %v61_v4, %v60_v2  ;;  %v63_v7 = vld [vmem:[#allocation5 + $0x28] sm:$0xff]  ;;  %v54_v9 = vld [vmem:[#allocation2] sm:$0xff]  ;;  %v64_v10 = vld [vmem:[#allocation5 + $0x30] sm:$0xff]  ;;  %s373_s13 = scalar_lea.vmem %s203_s12, 128  ;;  %p378_p3 = scmp.lt.s32.totalorder %s203_s12, %s203_s12 }
  0x29   :  { %272 = vmatprep.subr.bf16.mxu0 %v271_v3  ;;  %303 = vmatprep.subr.bf16.mxu1 %v271_v3  ;;  %v279_v8 = vpack.c.bf16 %v63_v7, %v62_v6  ;;  %v65_v11 = vld [vmem:[#allocation5 + $0x38] sm:$0xff]  ;;  %v56_v12 = vld [vmem:[#allocation2 + $0x10] sm:$0xff]  ;;  %v66_v14 = vld [vmem:[#allocation5 + $0x40] sm:$0xff]  ;;  %p374_p2 = scmp.ne.s32.totalorder %s203_s12, %s373_s13  ;;  %p379_p4 = scmp.lt.s32.totalorder %s373_s13, %s373_s13 }
  0x2a   :  { %274 = vmatpush3.bf16.msra.mxu0 %v271_v3  ;;  %311 = vmatpush3.bf16.msra.mxu1 %v271_v3  ;;  %v283_v13 = vpack.c.bf16 %v65_v11, %v64_v10  ;;  %v67_v15 = vld [vmem:[#allocation5 + $0x48] sm:$0xff]  ;;  %v68_v17 = vld [vmem:[#allocation5 + $0x50] sm:$0xff]  ;;  %v69_v18 = vld [vmem:[#allocation5 + $0x58] sm:$0xff] }
  0x2b   :  { %276 = vmatprep.subr.bf16.mxu0 %v275_v5  ;;  %304 = vmatprep.subr.bf16.mxu1 %v275_v5  ;;  %v287_v16 = vpack.c.bf16 %v67_v15, %v66_v14  ;;  %v291_v19 = vpack.c.bf16 %v69_v18, %v68_v17  ;;  %v70_v20 = vld [vmem:[#allocation5 + $0x60] sm:$0xff]  ;;  %v71_v21 = vld [vmem:[#allocation5 + $0x68] sm:$0xff]  ;;  %v72_v23 = vld [vmem:[#allocation5 + $0x70] sm:$0xff]  ;;  %p380_p5 = por %p379_p4, %p378_p3 }
  0x2c   :  { %265 = vmatprep.mubr.f32.mxu0 %v54_v9  ;;  %268 = vmatprep.mubr.f32.mxu1 %v56_v12  ;;  %v295_v22 = vpack.c.bf16 %v71_v21, %v70_v20  ;;  %v73_v24 = vld [vmem:[#allocation5 + $0x78] sm:$0xff]  ;;  %v55_v26 = vld [vmem:[#allocation2 + $0x8] sm:$0xff]  ;;  %v212_v28 = vld [vmem:[%s467_s2] ss:$0 sm:$0xff] }
  0x2d   :  { %v299_v25 = vpack.c.bf16 %v73_v24, %v72_v23  ;;  %v57_v27 = vld [vmem:[#allocation2 + $0x18] sm:$0xff]  ;;  %p381_p6 = pnand %p380_p5, %p374_p2 }
  0x2e   :  { %278 = vmatpush3.bf16.msra.mxu0 %v275_v5  ;;  %312 = vmatpush3.bf16.msra.mxu1 %v275_v5 }
  0x2f   :  { %280 = vmatprep.subr.bf16.mxu0 %v279_v8  ;;  %305 = vmatprep.subr.bf16.mxu1 %v279_v8 }
  0x32   :  { %282 = vmatpush3.bf16.msra.mxu0 %v279_v8  ;;  %313 = vmatpush3.bf16.msra.mxu1 %v279_v8 }
  0x33   :  { %284 = vmatprep.subr.bf16.mxu0 %v283_v13  ;;  %306 = vmatprep.subr.bf16.mxu1 %v283_v13 }
  0x36   :  { %286 = vmatpush3.bf16.msra.mxu0 %v283_v13  ;;  %314 = vmatpush3.bf16.msra.mxu1 %v283_v13 }
  0x37   :  { %288 = vmatprep.subr.bf16.mxu0 %v287_v16  ;;  %307 = vmatprep.subr.bf16.mxu1 %v287_v16 }
  0x3a   :  { %290 = vmatpush3.bf16.msra.mxu0 %v287_v16  ;;  %315 = vmatpush3.bf16.msra.mxu1 %v287_v16 }
  0x3b   :  { %292 = vmatprep.subr.bf16.mxu0 %v291_v19  ;;  %308 = vmatprep.subr.bf16.mxu1 %v291_v19 }
  0x3e   :  { %294 = vmatpush3.bf16.msra.mxu0 %v291_v19  ;;  %316 = vmatpush3.bf16.msra.mxu1 %v291_v19 }
  0x3f   :  { %296 = vmatprep.subr.bf16.mxu0 %v295_v22  ;;  %309 = vmatprep.subr.bf16.mxu1 %v295_v22 }
  0x42   :  { %298 = vmatpush3.bf16.msra.mxu0 %v295_v22  ;;  %317 = vmatpush3.bf16.msra.mxu1 %v295_v22 }
  0x43   :  { %300 = vmatprep.subr.bf16.mxu0 %v299_v25  ;;  %310 = vmatprep.subr.bf16.mxu1 %v299_v25 }
  0x46   :  { %302 = vmatpush3.bf16.msra.mxu0 %v299_v25  ;;  %318 = vmatpush3.bf16.msra.mxu1 %v299_v25 }
  0x49   :  { %266 = vmatmul.mubr.f32.vlgmr.msra.gmra.mrb[0].mxu0 %v55_v26  ;;  %269 = vmatmul.mubr.f32.vlgmr.msra.gmra.mrb[0].mxu1 %v57_v27 }
 0x11c   :  { %v267_v29 = vpop.f32.mrb[0].mxu0  ;;  %v270_v30 = vpop.f32.mrb[0].mxu1 }
 0x11d   :  { %v153_v31 = vadd.f32 %v267_v29, %v212_v28  ;;  %v147_v32 = vpop.f32.mrb[1].mxu0  ;;  %v157_v33 = vpop.f32.mrb[1].mxu1 }
 0x11e   :  { %v148_v34 = vadd.f32 %v212_v28, %v147_v32 }
 0x11f   :  { %325 = vtanh.f32 %v153_v31 }
 0x120   :  { %327 = vtanh.f32 %v148_v34 }
 0x129   :  { %v326_v35 = vpop.eup %325 }
 0x12a   :  { %v328_v36 = vpop.eup %327 }
 0x12b   :  { %v191_v37 = vadd.f32 %v328_v36, %v326_v35 }
 0x12d   :  { %195 = vst [vmem:[#allocation7] sm:$0xff] %v191_v37 }
 0x12e   :  { %384 = shalt.err (!%p381_p6)
}
 0x12f   :  { %s385_s15 = scalar_lea.hbm %s468_s3, 128 }
 0x130   :  { %p386_p7 = scmp.ne.s32.totalorder %s468_s3, %s385_s15  ;;  %p389_p8 = scmp.lt.u32.totalorder %s385_s15, %s468_s3 }
 0x132   :  { %p391_p9 = pnand %p389_p8, %p386_p7 }
 0x134   :  { %394 = shalt.err (!%p391_p9)
}
 0x135   :  { %205 = dma.vmem_to_hbm [thread:$0]  %s203_s12, 128, %s468_s3, [#allocation4]  }
 0x136   :  { %399 = dma.done.wait [#allocation4], 128  }
 0x137   :  { %400 = vsyncadd [#allocation4], 4294967168 }
 0x138   :  { %209 = vsyncpa [#allocation3], 1 }
 0x139   :  { %210 = vsyncpa [#allocation6], 1 }
 0x13a   :  { %211 = vsyncpa [#allocation4], 1 }

</bundles_post_ra>
